<compile_context>
chip_gen: v6e
topology: v6e:2x2x1
jax: 0.10.0
libtpu: 0.0.40
codegen_flags: <defaults>
</compile_context>

<pallas_src>
import functools

import jax
import jax.numpy as jnp
from jax.experimental import pallas as pl
from jax.experimental.pallas import tpu as pltpu


def _linear_kernel(x_ref, w_ref, b_ref, o_ref, acc_ref):
    """O[i,j] = sum_k X[i,k] @ W[k,j] + bias[j], accumulated in f32."""
    kk = pl.program_id(2)

    @pl.when(kk == 0)
    def _init():
        acc_ref[...] = jnp.zeros_like(acc_ref)

    # In-kernel upcast == PyTorch `.float()` before the Linear; HBM traffic
    # stays in the input's native dtype (e.g. bf16).
    x = x_ref[...].astype(jnp.float32)
    w = w_ref[...].astype(jnp.float32)
    acc_ref[...] += jnp.dot(x, w, preferred_element_type=jnp.float32)

    @pl.when(kk == pl.num_programs(2) - 1)
    def _finalize():
        o_ref[...] = (acc_ref[...] + b_ref[...].astype(jnp.float32)).astype(o_ref.dtype)


def _pick_tn(n):
    # 256-wide output tiles fill the v6e/v7x MXU and give lane-dense stores;
    # fall back to 128 (v5e MXU width), or the full dim for odd sizes.
    for cand in (256, 128):
        if n % cand == 0:
            return cand
    return n  # block == full array dim is always legal


def _pick_tk(d):
    # Keep the full reduction dim resident unless llm_dim is very large, in
    # which case split it so (tm, tk) + (tk, tn) tiles stay well inside VMEM.
    if d <= 4096:
        return d
    for cand in (4096, 2048, 1024, 512, 256, 128):
        if d % cand == 0:
            return cand
    return d


def linear_last_extract(last_hidden_state, weight, bias, *, k, l, tm=512):
    """Pallas implementation of LinearLastExtract.forward.

    Args:
      last_hidden_state: (B, T, llm_dim), any float dtype (upcast to f32 in-kernel).
      weight: (llm_dim, k*l)  -- nn.Linear.weight transposed.
      bias:   (k*l,)
    Returns:
      (taste_logits, training_info) with taste_logits (B, T, l, k) float32.
    """
    B, T, D = last_hidden_state.shape
    N = k * l
    assert weight.shape == (D, N)
    assert bias.shape == (N,)

    M = B * T
    x = last_hidden_state.reshape(M, D)          # native dtype, no wrapper cast
    b2 = bias.reshape(1, N)

    tn = _pick_tn(N)
    tk = _pick_tk(D)
    if M <= tm:
        tm = M                                   # single row tile (block == full dim)

    # Ragged M tail is handled by masked partial tiles, not wrapper-side padding.
    grid = (pl.cdiv(M, tm), N // tn, D // tk)

    # Double-buffered input/output tiles + f32 accumulator, with headroom.
    est = 2 * (tm * tk * x.dtype.itemsize
               + tk * tn * weight.dtype.itemsize
               + tn * b2.dtype.itemsize
               + tm * tn * 4) + tm * tn * 4
    vmem_limit = min(max(int(1.5 * est), 32 * 1024 * 1024), 64 * 1024 * 1024)

    out = pl.pallas_call(
        _linear_kernel,
        out_shape=jax.ShapeDtypeStruct((M, N), jnp.float32),
        grid_spec=pltpu.PrefetchScalarGridSpec(
            num_scalar_prefetch=0,
            grid=grid,
            in_specs=[
                pl.BlockSpec((tm, tk), lambda i, j, kk: (i, kk)),   # X row tile
                pl.BlockSpec((tk, tn), lambda i, j, kk: (kk, j)),   # W column tile
                pl.BlockSpec((1, tn), lambda i, j, kk: (0, j)),     # bias tile (tiny)
            ],
            out_specs=pl.BlockSpec((tm, tn), lambda i, j, kk: (i, j)),
            scratch_shapes=[pltpu.VMEM((tm, tn), jnp.float32)],
        ),
        compiler_params=pltpu.CompilerParams(
            dimension_semantics=("parallel", "parallel", "arbitrary"),
            vmem_limit_bytes=vmem_limit,
        ),
    )(x, weight, b2)

    taste_logits = out.reshape(B, T, l, k)
    training_info = {}
    return taste_logits, training_info


if __name__ == "__main__":
    # Small shapes consistent with the module: B=2, T=8, llm_dim=32, l=2, k=128.
    B, T, llm_dim = 2, 8, 32
    l, k = 2, 128

    key = jax.random.PRNGKey(0)
    k_x, k_w, k_b = jax.random.split(key, 3)

    # bf16 hidden states exercise the no-wrapper-cast path (cast happens in-kernel).
    last_hidden_state = jax.random.normal(
        k_x, (B, T, llm_dim), dtype=jnp.float32).astype(jnp.bfloat16)
    # Deterministic synthetic parameters (nn.Linear(llm_dim, k*l) shapes, f32).
    weight = jax.random.normal(k_w, (llm_dim, k * l), dtype=jnp.float32) * 0.02
    bias = jax.random.normal(k_b, (k * l,), dtype=jnp.float32) * 0.02

    fn = jax.jit(functools.partial(linear_last_extract, k=k, l=l))
    taste_logits, training_info = fn(last_hidden_state, weight, bias)
    taste_logits = jax.block_until_ready(taste_logits)

    # Reference: .float() then Linear, then reshape (B, T, l, k).
    x32 = last_hidden_state.astype(jnp.float32).reshape(B * T, llm_dim)
    ref = (jnp.dot(x32, weight, precision=jax.lax.Precision.HIGHEST) + bias
           ).reshape(B, T, l, k)

    assert taste_logits.shape == (B, T, l, k)
    assert taste_logits.dtype == jnp.float32
    assert jnp.allclose(taste_logits, ref, atol=1e-3, rtol=1e-3), \
        float(jnp.max(jnp.abs(taste_logits - ref)))
    assert training_info == {}

    print("KERNEL_OK")
</pallas_src>

<mosaic_0001>
module attributes {stable_mosaic.version = 11 : i64} {
  func.func @_linear_kernel(%arg0: i32, %arg1: i32, %arg2: i32, %arg3: memref<16x32xbf16, #tpu.memory_space<vmem>>, %arg4: memref<32x256xf32, #tpu.memory_space<vmem>>, %arg5: memref<1x256xf32, #tpu.memory_space<vmem>>, %arg6: memref<16x256xf32, #tpu.memory_space<vmem>>, %arg7: memref<16x256xf32, #tpu.memory_space<vmem>>) attributes {dimension_semantics = [#tpu.dimension_semantics<parallel>, #tpu.dimension_semantics<parallel>, #tpu.dimension_semantics<arbitrary>], iteration_bounds = array<i64: 1, 1, 1>, scalar_prefetch = 0 : i64, scratch_operands = 1 : i64, tpu.core_type = #tpu.core_type<tc>, window_params = [{transform_indices = @transform_0, window_bounds = array<i64: 16, 32>}, {transform_indices = @transform_1, window_bounds = array<i64: 32, 256>}, {transform_indices = @transform_2, window_bounds = array<i64: 1, 256>}, {transform_indices = @transform_3, window_bounds = array<i64: 16, 256>}]} {
    %c0_i32 = arith.constant 0 : i32
    %0 = arith.cmpi eq, %arg2, %c0_i32 : i32
    %1 = arith.extui %0 : i1 to i32
    %c0_i32_0 = arith.constant 0 : i32
    %2 = arith.cmpi ne, %1, %c0_i32_0 : i32
    scf.if %2 {
      %cst_10 = arith.constant 0.000000e+00 : f32
      %13 = vector.broadcast %cst_10 : f32 to vector<16x256xf32>
      %c0_11 = arith.constant 0 : index
      %c0_12 = arith.constant 0 : index
      %14 = vector.load %arg7[%c0_11, %c0_12] : memref<16x256xf32, #tpu.memory_space<vmem>>, vector<16x256xf32>
      tpu.vector_store %arg7[%c0_11, %c0_12], %13 {strides = array<i32>} : memref<16x256xf32, #tpu.memory_space<vmem>>, vector<16x256xf32>,
    } else {
    }
    %c0 = arith.constant 0 : index
    %c0_1 = arith.constant 0 : index
    %3 = vector.load %arg3[%c0, %c0_1] : memref<16x32xbf16, #tpu.memory_space<vmem>>, vector<16x32xbf16>
    %4 = arith.extf %3 : vector<16x32xbf16> to vector<16x32xf32>
    %c0_2 = arith.constant 0 : index
    %c0_3 = arith.constant 0 : index
    %5 = vector.load %arg4[%c0_2, %c0_3] : memref<32x256xf32, #tpu.memory_space<vmem>>, vector<32x256xf32>
    %c0_4 = arith.constant 0 : index
    %c0_5 = arith.constant 0 : index
    %6 = vector.load %arg7[%c0_4, %c0_5] : memref<16x256xf32, #tpu.memory_space<vmem>>, vector<16x256xf32>
    %cst = arith.constant dense<0.000000e+00> : vector<16x256xf32>
    %7 = tpu.matmul %4, %5, %cst {dimension_numbers = #tpu.dot_dimension_numbers<[1], [0], [0], [1], [0, 0, 1, 1], [], []>} : vector<16x32xf32>, vector<32x256xf32>, vector<16x256xf32> -> vector<16x256xf32>
    %8 = arith.addf %6, %7 : vector<16x256xf32>
    %c0_6 = arith.constant 0 : index
    %c0_7 = arith.constant 0 : index
    %9 = vector.load %arg7[%c0_6, %c0_7] : memref<16x256xf32, #tpu.memory_space<vmem>>, vector<16x256xf32>
    tpu.vector_store %arg7[%c0_6, %c0_7], %8 {strides = array<i32>} : memref<16x256xf32, #tpu.memory_space<vmem>>, vector<16x256xf32>,
    %c0_i32_8 = arith.constant 0 : i32
    %10 = arith.cmpi eq, %arg2, %c0_i32_8 : i32
    %11 = arith.extui %10 : i1 to i32
    %c0_i32_9 = arith.constant 0 : i32
    %12 = arith.cmpi ne, %11, %c0_i32_9 : i32
    scf.if %12 {
      %c0_10 = arith.constant 0 : index
      %c0_11 = arith.constant 0 : index
      %13 = vector.load %arg7[%c0_10, %c0_11] : memref<16x256xf32, #tpu.memory_space<vmem>>, vector<16x256xf32>
      %c0_12 = arith.constant 0 : index
      %c0_13 = arith.constant 0 : index
      %14 = vector.load %arg5[%c0_12, %c0_13] : memref<1x256xf32, #tpu.memory_space<vmem>>, vector<1x256xf32>
      %15 = vector.broadcast %14 : vector<1x256xf32> to vector<16x256xf32>
      %16 = arith.addf %13, %15 : vector<16x256xf32>
      %c0_14 = arith.constant 0 : index
      %c0_15 = arith.constant 0 : index
      %17 = vector.load %arg6[%c0_14, %c0_15] : memref<16x256xf32, #tpu.memory_space<vmem>>, vector<16x256xf32>
      tpu.vector_store %arg6[%c0_14, %c0_15], %16 {strides = array<i32>} : memref<16x256xf32, #tpu.memory_space<vmem>>, vector<16x256xf32>,
    } else {
    }
    return
  }
  func.func @transform_0(%arg0: i32, %arg1: i32, %arg2: i32) -> (i32, i32) {
    %c0_i32 = arith.constant 0 : i32
    return %arg0, %arg2 : i32, i32
  }
  func.func @transform_1(%arg0: i32, %arg1: i32, %arg2: i32) -> (i32, i32) {
    %c0_i32 = arith.constant 0 : i32
    return %arg2, %arg1 : i32, i32
  }
  func.func @transform_2(%arg0: i32, %arg1: i32, %arg2: i32) -> (i32, i32) {
    %c0_i32 = arith.constant 0 : i32
    %c0_i32_0 = arith.constant 0 : i32
    return %c0_i32, %arg1 : i32, i32
  }
  func.func @transform_3(%arg0: i32, %arg1: i32, %arg2: i32) -> (i32, i32) {
    %c0_i32 = arith.constant 0 : i32
    return %arg0, %arg1 : i32, i32
  }
}

</mosaic_0001>

<bundles_post_ra>
// kernel: linear_last_extract.1
= control target key start
LH: loop header
LB: loop body
LE: loop exit
PB: predicated region body
PF: predicated region fallthrough
CT: control target
= control target key end

     0   :  { %8 = vsyncpa [#allocation4], 0  ;;  %s304_s0 = inlined_call_operand.hbm [shape: bf16[16,32], index: 0, kind: input, shape index: {}]   ;;  %s305_s1 = inlined_call_operand.hbm [shape: f32[32,256], index: 1, kind: input, shape index: {}]   ;;  %s306_s2 = inlined_call_operand.vmem [shape: f32[1,256], index: 2, kind: input, shape index: {}]   ;;  %s307_s3 = inlined_call_operand.vmem [shape: f32[16,256], index: 3, kind: output, shape index: {}]  }
   0x1   :  { %9 = vsyncpa [#allocation6], 0  ;;  %s256_s12 = smov [#allocation3]  }
   0x2   :  { %s15_s13 = sshll.u32 %s256_s12, 4  ;;  %s16_s13 = int_to_ptr.vmem [resolvable:$true] %s15_s13 }
   0x3   :  { %s220_s14 = scalar_lea.vmem %s16_s13, 128  ;;  %p225_p1 = scmp.lt.s32.totalorder %s16_s13, %s16_s13 }
   0x4   :  { %p221_p0 = scmp.ne.s32.totalorder %s16_s13, %s220_s14  ;;  %p226_p2 = scmp.lt.s32.totalorder %s220_s14, %s220_s14 }
   0x6   :  { %p227_p3 = por %p226_p2, %p225_p1 }
   0x8   :  { %p228_p4 = pnand %p227_p3, %p221_p0 }
   0xa   :  { %231 = shalt.err (!%p228_p4)
}
   0xb   :  { %s257_s15 = smov 64   ;;  %s258_s16 = smov 4  }
   0xc   :  { %21 = dma.hbm_to_vmem [thread:$0]  %s304_s0, 128, %s16_s13, [#allocation4], %s257_s15, %s257_s15, %s258_s16  }
   0xd   :  { %s259_s19 = smov [#allocation5]  }
   0xe   :  { %s27_s20 = sshll.u32 %s259_s19, 4  ;;  %s28_s20 = int_to_ptr.vmem [resolvable:$true] %s27_s20 }
   0xf   :  { %s240_s21 = scalar_lea.vmem %s28_s20, 1024  ;;  %p245_p6 = scmp.lt.s32.totalorder %s28_s20, %s28_s20 }
  0x10   :  { %p241_p5 = scmp.ne.s32.totalorder %s28_s20, %s240_s21  ;;  %p246_p7 = scmp.lt.s32.totalorder %s240_s21, %s240_s21 }
  0x12   :  { %p247_p8 = por %p246_p7, %p245_p6 }
  0x14   :  { %p248_p9 = pnand %p247_p8, %p241_p5 }
  0x16   :  { %251 = shalt.err (!%p248_p9)
}
  0x17   :  { %s260_s22 = smov 256   ;;  %s261_s23 = smov 16  }
  0x18   :  { %33 = dma.hbm_to_vmem [thread:$0]  %s305_s1, 1024, %s28_s20, [#allocation6], %s260_s22, %s260_s22, %s261_s23  }
  0x19   :  { %252 = dma.done.wait [#allocation4], 128  }
  0x1a   :  { %253 = vsyncadd [#allocation4], 4294967168 }
  0x1b   :  { %254 = dma.done.wait [#allocation6], 1024  }
  0x1c   :  { %255 = vsyncadd [#allocation6], 4294966272  ;;  %v262_v0 = vmov 0.0   ;;  %v61_v1 = vld [vmem:[#allocation5 + $0x38] sm:$0xff]  ;;  %v60_v2 = vld [vmem:[#allocation5 + $0x30] sm:$0xff]  ;;  %vm66_vm0 = vcmask 261120   ;;  %v167_v12 = vlaneseq }
  0x1d   :  { %137 = vmatprep.mubr.f32.mxu0 %v262_v0  ;;  %143 = vmatprep.mubr.f32.mxu1 %v262_v0  ;;  %v59_v3 = vld [vmem:[#allocation5 + $0x28] sm:$0xff]  ;;  %v58_v4 = vld [vmem:[#allocation5 + $0x20] sm:$0xff]  ;;  %v57_v5 = vld [vmem:[#allocation5 + $0x18] sm:$0xff] }
  0x1e   :  { %97 = vmatprep.subr.mxu0 %v61_v1  ;;  %197 = vmatprep.subr.mxu1 %v61_v1  ;;  %v194_v6 = vld [vmem:[#allocation3] sm:$0xff]   ;;  %v56_v7 = vld [vmem:[#allocation5 + $0x10] sm:$0xff]  ;;  %v55_v8 = vld [vmem:[#allocation5 + $0x8] sm:$0xff]  ;;  %v168_v13 = vshrl.u32 %v167_v12, 7 }
  0x1f   :  { %98 = vmatpush1.msra.mxu0 %v60_v2  ;;  %201 = vmatpush1.msra.mxu1 %v60_v2  ;;  %v54_v9 = vld [vmem:[#allocation5] sm:$0xff]  ;;  %v195_v10 = vunpack.c.l.bf16 %v194_v6  ;;  %v196_v11 = vunpack.c.h.bf16 %v194_v6  ;;  %v165_v15 = vld [vmem:[%s306_s2] sm:$0x3] }
  0x20   :  { %99 = vmatprep.subr.mxu0 %v59_v3  ;;  %198 = vmatprep.subr.mxu1 %v59_v3  ;;  %v169_v14 = vsub.s32 0, %v168_v13  ;;  %v173_v16 = vsub.s32 1, %v168_v13 }
  0x21   :  { %100 = vmatpush1.msra.mxu0 %v58_v4  ;;  %202 = vmatpush1.msra.mxu1 %v58_v4 }
  0x22   :  { %101 = vmatprep.subr.mxu0 %v57_v5  ;;  %199 = vmatprep.subr.mxu1 %v57_v5  ;;  %v170_v17 = vrot.slane %v165_v15, %v169_v14  ;;  %v174_v18 = vrot.slane %v165_v15, %v173_v16 }
  0x23   :  { %102 = vmatpush1.msra.mxu0 %v56_v7  ;;  %203 = vmatpush1.msra.mxu1 %v56_v7 }
  0x24   :  { %103 = vmatprep.subr.mxu0 %v55_v8  ;;  %200 = vmatprep.subr.mxu1 %v55_v8 }
  0x25   :  { %104 = vmatpush1.msra.mxu0 %v54_v9  ;;  %204 = vmatpush1.msra.mxu1 %v54_v9 }
  0x26   :  { %191 = vmatmul.mubr.msk.f32.vlgmr.msra.gmra.mxu0 %vm66_vm0, %v195_v10  ;;  %192 = vmatmul.mubr.msk.f32.vlgmr.msra.gmra.mxu1 %vm66_vm0, %v196_v11 }
  0xe6   :  { %v139_v19 = vpop.f32.mrf.mxu0  ;;  %v145_v20 = vpop.f32.mrf.mxu1 }
  0xe7   :  { %v177_v21 = vadd.f32 %v170_v17, %v139_v19  ;;  %v179_v22 = vadd.f32 %v170_v17, %v145_v20 }
  0xe8   :  { %v141_v23 = vpop.f32.mrf.mxu0  ;;  %v147_v24 = vpop.f32.mrf.mxu1 }
  0xe9   :  { %181 = vst [vmem:[%s307_s3] sm:$0xff] %v177_v21  ;;  %183 = vst [vmem:[%s307_s3 + $0x10] sm:$0xff] %v179_v22  ;;  %v178_v25 = vadd.f32 %v174_v18, %v141_v23  ;;  %v180_v26 = vadd.f32 %v174_v18, %v147_v24 }
  0xeb   :  { %182 = vst [vmem:[%s307_s3 + $0x8] sm:$0xff] %v178_v25  ;;  %184 = vst [vmem:[%s307_s3 + $0x18] sm:$0xff] %v180_v26 }
  0xec   :  { %189 = vsyncpa [#allocation4], 1 }
  0xed   :  { %190 = vsyncpa [#allocation6], 1 }

</bundles_post_ra>
